<compile_context>
chip_gen: v7x
topology: tpu7x:2x2x1
jax: 0.10.0
libtpu: 0.0.40
codegen_flags: <defaults>
</compile_context>

<pallas_src>
import jax
import jax.numpy as jnp
from jax.experimental import pallas as pl
from jax.experimental.pallas import tpu as pltpu


# Prefer the widest lane that exactly divides the element count (lane-dense,
# unmasked vector stores); 128 is the minimum full-vreg lane width.
_LANE_CANDIDATES = (1024, 512, 256, 128)
# ~2 MiB f32 per block: in+out double-buffered = 8 MiB, fits every generation's
# scoped-VMEM default (v5e 16 MiB, v6e 32 MiB, v7x 32 MiB) with headroom.
_BLOCK_TARGET_ELEMS = 512 * 1024


def _fused_affine_kernel(params_ref, x_ref, o_ref):
    """o = x * w + b with the two 1x1 convs pre-folded into (w, b).

    params_ref : SMEM (2,) float32 = [w_folded, b_folded]
    x_ref      : VMEM (block_rows, lane) float32
    o_ref      : VMEM (block_rows, lane) float32
    """
    o_ref[...] = x_ref[...] * params_ref[0] + params_ref[1]


def _run_fused_affine(x2d, params, block_rows, lane, grid):
    total = x2d.shape[0] * x2d.shape[1]
    return pl.pallas_call(
        _fused_affine_kernel,
        out_shape=jax.ShapeDtypeStruct(x2d.shape, jnp.float32),
        grid=grid,
        in_specs=[
            pl.BlockSpec(memory_space=pltpu.MemorySpace.SMEM),   # scalar params
            pl.BlockSpec((block_rows, lane), lambda i: (i, 0)),  # input tile
        ],
        out_specs=pl.BlockSpec((block_rows, lane), lambda i: (i, 0)),
        compiler_params=pltpu.CompilerParams(
            dimension_semantics=("parallel",),  # v7x: split blocks over 2 TCs
        ),
        cost_estimate=pl.CostEstimate(
            flops=2 * total, transcendentals=0, bytes_accessed=8 * total),
    )(params, x2d)


def _model_to_get_forward(x_nchw, w1, b1, w2, b2):
    """x_nchw: [N, 1, H, W] float32. Returns [N, 1, H, W] float32."""
    n, c, h, w = x_nchw.shape
    assert c == 1, "ModelToGet's first conv is Conv2d(1, 1, kernel_size=1)"

    # Fold (conv1x1 + bias) -> Identity -> (conv1x1 + bias) into one affine.
    w1s = w1.reshape(()).astype(jnp.float32)
    b1s = b1.reshape(()).astype(jnp.float32)
    w2s = w2.reshape(()).astype(jnp.float32)
    b2s = b2.reshape(()).astype(jnp.float32)
    params = jnp.stack([w1s * w2s, b1s * w2s + b2s])

    total = n * c * h * w
    flat = x_nchw.astype(jnp.float32).reshape(-1)

    # Pick a lane width that divides the element count so the 2-D view is a
    # zero-copy reshape (no jnp.pad, no output slice).
    lane = next((cand for cand in _LANE_CANDIDATES if total % cand == 0), None)
    if lane is None:
        # Rare fallback (total not a multiple of 128): pad by < 128 elements.
        lane = 128
        rows = pl.cdiv(total, lane)
        flat = jnp.pad(flat, (0, rows * lane - total))
    else:
        rows = total // lane

    x2d = flat.reshape(rows, lane)

    if rows < 16:
        # Tiny inputs: one full-extent block, no per-step pipeline overhead.
        block_rows = rows
        grid = (1,)
    else:
        # Tiled path: ~2 MiB blocks, but never fewer than 2 blocks so the
        # megacore split actually engages on v7x; partial last block is masked
        # by Pallas (block_rows is a multiple of 8, rows need not be).
        target = max(8, (_BLOCK_TARGET_ELEMS // lane) // 8 * 8)
        half = pl.cdiv(pl.cdiv(rows, 2), 8) * 8
        block_rows = min(target, half)
        grid = (pl.cdiv(rows, block_rows),)

    out2d = _run_fused_affine(x2d, params, block_rows, lane, grid)

    out_flat = out2d.reshape(-1)
    if rows * lane != total:
        out_flat = out_flat[:total]
    return out_flat.reshape(n, c, h, w)


# jit so the reshape/cast plumbing is pure metadata (bitcasts) around the call.
model_to_get_forward = jax.jit(_model_to_get_forward)


if __name__ == "__main__":
    key = jax.random.PRNGKey(0)
    k_x, k_w1, k_b1, k_w2, k_b2 = jax.random.split(key, 5)

    # Small shapes consistent with the module: Conv2d(1, 1, 1) => C_in = 1.
    N, C, H, W = 2, 1, 16, 16
    x = jax.random.normal(k_x, (N, C, H, W), dtype=jnp.float32)

    # Parameter shapes from the module: two 1x1 single-channel convs w/ bias.
    w1 = jax.random.normal(k_w1, (1, 1, 1, 1), dtype=jnp.float32)
    b1 = jax.random.normal(k_b1, (1,), dtype=jnp.float32)
    w2 = jax.random.normal(k_w2, (1, 1, 1, 1), dtype=jnp.float32)
    b2 = jax.random.normal(k_b2, (1,), dtype=jnp.float32)

    def ref_fn(xx):
        # Sequential (un-folded) pure-JAX reference of the same forward pass.
        return (xx * w1.reshape(()) + b1.reshape(())) * w2.reshape(()) + b2.reshape(())

    # 1) Small-shape path (single lane-dense block, lane=512 divides 512 elems).
    out = jax.block_until_ready(model_to_get_forward(x, w1, b1, w2, b2))
    assert out.shape == (N, C, H, W)
    assert jnp.allclose(out, ref_fn(x), atol=1e-5, rtol=1e-5)

    # 2) Tiled/pipelined path: 2x1x600x600 = 720000 elems -> lane=128, no pad,
    #    2 blocks (megacore split), masked partial edge block.
    x_big = jax.random.normal(k_x, (2, 1, 600, 600), dtype=jnp.float32)
    out_big = jax.block_until_ready(model_to_get_forward(x_big, w1, b1, w2, b2))
    assert out_big.shape == x_big.shape
    assert jnp.allclose(out_big, ref_fn(x_big), atol=1e-5, rtol=1e-5)

    # 3) Rare fallback path: element count not a multiple of 128.
    x_odd = jax.random.normal(k_x, (1, 1, 5, 7), dtype=jnp.float32)
    out_odd = jax.block_until_ready(model_to_get_forward(x_odd, w1, b1, w2, b2))
    assert out_odd.shape == x_odd.shape
    assert jnp.allclose(out_odd, ref_fn(x_odd), atol=1e-5, rtol=1e-5)

    print("KERNEL_OK")
</pallas_src>

<mosaic_0001>
module attributes {stable_mosaic.version = 11 : i64} {
  func.func @_fused_affine_kernel(%arg0: i32, %arg1: memref<2xf32, #tpu.memory_space<smem>>, %arg2: memref<1x512xf32, #tpu.memory_space<vmem>>, %arg3: memref<1x512xf32, #tpu.memory_space<vmem>>) attributes {dimension_semantics = [#tpu.dimension_semantics<parallel>], iteration_bounds = array<i64: 1>, scalar_prefetch = 0 : i64, scratch_operands = 0 : i64, tpu.core_type = #tpu.core_type<tc>, window_params = [{transform_indices = @transform_0, window_bounds = array<i64: 2>}, {transform_indices = @transform_1, window_bounds = array<i64: 1, 512>}, {transform_indices = @transform_2, window_bounds = array<i64: 1, 512>}]} {
    %c0 = arith.constant 0 : index
    %c0_0 = arith.constant 0 : index
    %0 = vector.load %arg2[%c0, %c0_0] : memref<1x512xf32, #tpu.memory_space<vmem>>, vector<1x512xf32>
    %c0_1 = arith.constant 0 : index
    %1 = memref.load %arg1[%c0_1] : memref<2xf32, #tpu.memory_space<smem>>
    %2 = vector.broadcast %1 : f32 to vector<1x512xf32>
    %3 = arith.mulf %0, %2 : vector<1x512xf32>
    %c1 = arith.constant 1 : index
    %4 = memref.load %arg1[%c1] : memref<2xf32, #tpu.memory_space<smem>>
    %5 = vector.broadcast %4 : f32 to vector<1x512xf32>
    %6 = arith.addf %3, %5 : vector<1x512xf32>
    %c0_2 = arith.constant 0 : index
    %c0_3 = arith.constant 0 : index
    %7 = vector.load %arg3[%c0_2, %c0_3] : memref<1x512xf32, #tpu.memory_space<vmem>>, vector<1x512xf32>
    tpu.vector_store %arg3[%c0_2, %c0_3], %6 {strides = array<i32>} : memref<1x512xf32, #tpu.memory_space<vmem>>, vector<1x512xf32>,
    return
  }
  func.func @transform_0(%arg0: i32) -> i32 {
    %c0_i32 = arith.constant 0 : i32
    %c0_i32_0 = arith.constant 0 : i32
    return %c0_i32 : i32
  }
  func.func @transform_1(%arg0: i32) -> (i32, i32) {
    %c0_i32 = arith.constant 0 : i32
    %c0_i32_0 = arith.constant 0 : i32
    return %arg0, %c0_i32 : i32, i32
  }
  func.func @transform_2(%arg0: i32) -> (i32, i32) {
    %c0_i32 = arith.constant 0 : i32
    %c0_i32_0 = arith.constant 0 : i32
    return %arg0, %c0_i32 : i32, i32
  }
}

</mosaic_0001>

<bundles_post_ra>
// kernel: _model_to_get_forward.1
= control target key start
LH: loop header
LB: loop body
LE: loop exit
PB: predicated region body
PF: predicated region fallthrough
CT: control target
= control target key end

     0   :  { %7 = vsyncpa [#allocation3], 0  ;;  %s82_s0 = inlined_call_operand.vmem [shape: f32[2], index: 0, kind: input, shape index: {}]   ;;  %s83_s1 = inlined_call_operand.vmem [shape: f32[1,512], index: 1, kind: input, shape index: {}]   ;;  %s84_s2 = inlined_call_operand.vmem [shape: f32[1,512], index: 2, kind: output, shape index: {}]  }
   0x1   :  { %s14_s11 = sshll.u32 %s82_s0, 4  ;;  %s15_s11 = int_to_ptr.vmem [resolvable:$true] %s14_s11 }
   0x2   :  { %s43_s12 = scalar_lea.vmem %s15_s11, 16  ;;  %p48_p1 = scmp.lt.s32.totalorder %s15_s11, %s15_s11 }
   0x3   :  { %p44_p0 = scmp.ne.s32.totalorder %s15_s11, %s43_s12  ;;  %p49_p2 = scmp.lt.s32.totalorder %s43_s12, %s43_s12 }
   0x5   :  { %p50_p3 = por %p49_p2, %p48_p1 }
   0x7   :  { %p51_p4 = pnand %p50_p3, %p44_p0 }
   0x9   :  { %54 = shalt.err (!%p51_p4)
}
   0xa   :  { %s57_s13 = smov [#allocation2]  }
   0xb   :  { %17 = dma.vmem_to_smem %s15_s11, 16, %s57_s13, [#allocation3]  }
   0xc   :  { %55 = dma.done.wait [#allocation3], 16  }
   0xd   :  { %56 = vsyncadd [#allocation3], 4294967280 }
   0xe   :  { %23 = sfence }
   0xf   :  { %s25_s14 = sld [smem:[#allocation2]]  ;;  %s41_s15 = sld [smem:[#allocation2 + $0x1]]  ;;  %v24_v0 = vld [vmem:[%s83_s1] sm:$0xf]  ;;  %v31_v1 = vlaneseq }
  0x11   :  { %vm33_vm0 = vcmp.lt.s32.totalorder %v31_v1, 512 }
  0x15   :  { %v26_v2 = vstv %s25_s14  ;;  %v29_v3 = vstv %s41_s15 }
  0x16   :  { %v27_v4 = vmul.f32 %v26_v2, %v24_v0 }
  0x18   :  { %v30_v5 = vadd.f32 %v29_v3, %v27_v4 }
  0x1a   :  { %35 = vst.msk [vmem:[%s84_s2] sm:$0xf] %vm33_vm0, %v30_v5 }
  0x1b   :  { %40 = vsyncpa [#allocation3], 1 }

</bundles_post_ra>
